<compile_context>
chip_gen: v5e
topology: v5e:2x2
jax: 0.10.0
libtpu: 0.0.40
codegen_flags: <defaults>
</compile_context>

<pallas_src>
import functools

import jax
import jax.numpy as jnp
from jax.experimental import pallas as pl
from jax.experimental.pallas import tpu as pltpu


def _round_up(a, b):
    return (a + b - 1) // b * b


def _vmem_capacity_bytes():
    """Physical per-core VMEM; conservative 128 MiB fallback if query fails."""
    try:
        return int(pltpu.get_tpu_info().vmem_capacity_bytes)
    except Exception:
        return 128 << 20


def image_proj_kernel(x_ref, w1_ref, b1_ref, g_ref, beta_ref, w2_ref, b2_ref,
                      o_ref, *, inv_hidden, exact_gelu):
    # ---- Linear 1 (MXU): bf16 operands, f32 accumulation ----
    h = jnp.dot(x_ref[...], w1_ref[...], preferred_element_type=jnp.float32)
    h = h + b1_ref[...]                                       # (TM, hid_p) f32

    # ---- GELU ----
    # Tanh form by default: lowers to the (otherwise idle) EUP slot rather
    # than an erf VPU polynomial that competes with the LayerNorm VALU work.
    h = jax.nn.gelu(h, approximate=not exact_gelu)

    # ---- LayerNorm over the hidden axis (eps = 1e-5, PyTorch default) ----
    # Single-pass statistics are required for padded-column correctness:
    # padded hidden columns are exactly zero (zero W1 cols / b1), so they add
    # nothing to s1/s2 and we divide by the *true* hidden size.  gamma/beta
    # padding zeroes those columns again after normalization.
    s1 = jnp.sum(h, axis=-1, keepdims=True)
    s2 = jnp.sum(h * h, axis=-1, keepdims=True)
    mean = s1 * inv_hidden
    var = s2 * inv_hidden - mean * mean
    h = (h - mean) * jax.lax.rsqrt(var + 1e-5)
    h = h * g_ref[...] + beta_ref[...]

    # ---- Linear 2 (MXU) ----
    y = jnp.dot(h.astype(jnp.bfloat16), w2_ref[...],
                preferred_element_type=jnp.float32)
    o_ref[...] = (y + b2_ref[...]).astype(o_ref.dtype)


def image_proj_model(x, w1, b1, gamma, beta, w2, b2, *, row_tile=None,
                     exact_gelu=False):
    """x: (B, S, in_dim) -> (B, S, out_dim)."""
    B, S, in_dim = x.shape
    hidden = w1.shape[1]
    out_dim = w2.shape[1]
    N = B * S
    out_dtype = x.dtype

    # Lane-dense padding: matmul lane axes and output last dim are multiples
    # of 128 (full MXU lane occupancy, unmasked vector stores).
    in_p = _round_up(in_dim, 128)
    hid_p = _round_up(hidden, 128)
    out_p = _round_up(out_dim, 128)

    vmem_cap = _vmem_capacity_bytes()

    # Row tiling.  Small N => ONE grid step: the kernel is weight-HBM-bandwidth
    # bound, so sharding rows across v7x's two TensorCores would only duplicate
    # the dominant weight DMA.  Larger N: generation-aware tile so the f32 h
    # intermediate + double-buffered x/out tiles fit next to the
    # single-buffered weights.
    N8 = _round_up(N, 8)
    if row_tile is None:
        if N8 <= 256:
            row_tile = N8
        elif vmem_cap <= (64 << 20):        # v7x-class: 64 MiB VMEM per core
            row_tile = 128 if hid_p >= 4096 else 256
        else:                               # v5e / v6e: 128 MiB VMEM
            row_tile = 512 if hid_p <= 2048 else 256
    row_tile = min(_round_up(row_tile, 8), N8)
    N_pad = _round_up(N8, row_tile)
    grid = (N_pad // row_tile,)

    # ---- Pad / cast operands (skip the scatter copy when already aligned) ----
    x_flat = x.reshape(N, in_dim)
    if N_pad == N and in_p == in_dim:
        x2 = x_flat.astype(jnp.bfloat16)
    else:
        x2 = jnp.zeros((N_pad, in_p), jnp.bfloat16).at[:N, :in_dim].set(
            x_flat.astype(jnp.bfloat16))

    def _pad_mat(w, r, c, rp, cp):
        wb = w.astype(jnp.bfloat16)
        if rp == r and cp == c:
            return wb
        return jnp.zeros((rp, cp), jnp.bfloat16).at[:r, :c].set(wb)

    def _pad_vec(v, c, cp):
        vf = v.astype(jnp.float32).reshape(1, c)
        if cp == c:
            return vf
        return jnp.zeros((1, cp), jnp.float32).at[:, :c].set(vf)

    w1_p = _pad_mat(w1, in_dim, hidden, in_p, hid_p)
    w2_p = _pad_mat(w2, hidden, out_dim, hid_p, out_p)
    b1_p = _pad_vec(b1, hidden, hid_p)
    g_p = _pad_vec(gamma, hidden, hid_p)
    be_p = _pad_vec(beta, hidden, hid_p)
    b2_p = _pad_vec(b2, out_dim, out_p)

    # Advisory cost estimate for the XLA scheduler.
    flops = 2 * N_pad * (in_p * hid_p + hid_p * out_p)
    transcendentals = N_pad * hid_p                       # tanh/erf in GELU
    bytes_accessed = (x2.size * 2                          # bf16 x
                      + (w1_p.size + w2_p.size) * 2        # bf16 weights
                      + (b1_p.size + g_p.size + be_p.size + b2_p.size) * 4
                      + N_pad * out_p * 4)                 # f32 output
    cost = pl.CostEstimate(flops=flops, transcendentals=transcendentals,
                           bytes_accessed=bytes_accessed)

    # VMEM budget from actual tile sizes: double-buffered streamed x (bf16) and
    # out (f32) tiles, single-buffered weights/params, f32 intermediates, plus
    # a small fixed allowance for compiler scratch.  Cap at 75% of physical
    # VMEM so the compiler keeps headroom (≈48 MiB on v7x, ≈96 MiB on v5e/v6e).
    vmem_need = (2 * row_tile * in_p * 2
                 + 2 * row_tile * out_p * 4
                 + (in_p * hid_p + hid_p * out_p) * 2
                 + (3 * hid_p + out_p) * 4
                 + 4 * row_tile * hid_p * 4)
    vmem_limit = int(min(max(vmem_need + (4 << 20), 16 << 20),
                         int(vmem_cap * 0.75)))

    kern = functools.partial(image_proj_kernel, inv_hidden=1.0 / hidden,
                             exact_gelu=exact_gelu)

    # Single grid step: no point sharding; multi-step: shard rows across cores.
    dim_sem = ("parallel",) if grid[0] > 1 else ("arbitrary",)

    out = pl.pallas_call(
        kern,
        out_shape=jax.ShapeDtypeStruct((N_pad, out_p), out_dtype),
        grid_spec=pltpu.PrefetchScalarGridSpec(
            num_scalar_prefetch=0,
            grid=grid,
            in_specs=[
                # Streamed x row-tiles (double-buffered across the grid).
                pl.BlockSpec((row_tile, in_p), lambda i: (i, 0)),
                # Grid-invariant operands: constant index_map + single buffer
                # (fetched once, half the VMEM of the default Buffered(2)).
                pl.BlockSpec((in_p, hid_p), lambda i: (0, 0),
                             pipeline_mode=pl.Buffered(1)),     # W1 (bf16)
                pl.BlockSpec((1, hid_p), lambda i: (0, 0),
                             pipeline_mode=pl.Buffered(1)),     # b1
                pl.BlockSpec((1, hid_p), lambda i: (0, 0),
                             pipeline_mode=pl.Buffered(1)),     # LN gamma
                pl.BlockSpec((1, hid_p), lambda i: (0, 0),
                             pipeline_mode=pl.Buffered(1)),     # LN beta
                pl.BlockSpec((hid_p, out_p), lambda i: (0, 0),
                             pipeline_mode=pl.Buffered(1)),     # W2 (bf16)
                pl.BlockSpec((1, out_p), lambda i: (0, 0),
                             pipeline_mode=pl.Buffered(1)),     # b2
            ],
            out_specs=pl.BlockSpec((row_tile, out_p), lambda i: (i, 0)),
        ),
        compiler_params=pltpu.CompilerParams(
            dimension_semantics=dim_sem,
            vmem_limit_bytes=vmem_limit),
        cost_estimate=cost,
    )(x2, w1_p, b1_p, g_p, be_p, w2_p, b2_p)

    return out[:N, :out_dim].reshape(B, S, out_dim)


def reference(x, w1, b1, gamma, beta, w2, b2):
    """Pure-f32 reference matching the PyTorch module semantics (eval mode)."""
    h = jnp.einsum("bsi,ih->bsh", x, w1) + b1
    h = jax.nn.gelu(h, approximate=False)
    mean = jnp.mean(h, axis=-1, keepdims=True)
    var = jnp.mean((h - mean) ** 2, axis=-1, keepdims=True)
    h = (h - mean) * jax.lax.rsqrt(var + 1e-5)
    h = h * gamma + beta
    return jnp.einsum("bsh,ho->bso", h, w2) + b2


if __name__ == "__main__":
    # Small, module-consistent shapes.
    B, S = 2, 8
    in_dim, hidden_dim, out_dim = 32, 64, 32

    key = jax.random.PRNGKey(0)
    kx, kw1, kb1, kw2, kb2 = jax.random.split(key, 5)

    x = jax.random.normal(kx, (B, S, in_dim), dtype=jnp.float32)

    # Deterministic synthetic parameters (no checkpoint load).
    w1 = jax.random.normal(kw1, (in_dim, hidden_dim), jnp.float32) * 0.05
    b1 = jax.random.normal(kb1, (hidden_dim,), jnp.float32) * 0.01
    gamma = jnp.ones((hidden_dim,), jnp.float32)
    beta = jnp.zeros((hidden_dim,), jnp.float32)
    w2 = jax.random.normal(kw2, (hidden_dim, out_dim), jnp.float32) * 0.05
    b2 = jax.random.normal(kb2, (out_dim,), jnp.float32) * 0.01

    y = image_proj_model(x, w1, b1, gamma, beta, w2, b2)
    y = jax.block_until_ready(y)

    y_ref = reference(x, w1, b1, gamma, beta, w2, b2)
    assert y.shape == (B, S, out_dim)
    # Kernel uses bf16 weights/activations on the MXU (f32 accumulation) and a
    # tanh GELU, so compare to the pure-f32 erf reference with a loosened
    # tolerance.
    assert jnp.allclose(y, y_ref, atol=5e-2, rtol=5e-2), "mismatch vs reference"

    print("KERNEL_OK")
</pallas_src>

<mosaic_0001>
module attributes {stable_mosaic.version = 11 : i64} {
  func.func @image_proj_kernel(%arg0: i32, %arg1: memref<16x128xbf16, #tpu.memory_space<vmem>>, %arg2: memref<128x128xbf16, #tpu.memory_space<vmem>>, %arg3: memref<1x128xf32, #tpu.memory_space<vmem>>, %arg4: memref<1x128xf32, #tpu.memory_space<vmem>>, %arg5: memref<1x128xf32, #tpu.memory_space<vmem>>, %arg6: memref<128x128xbf16, #tpu.memory_space<vmem>>, %arg7: memref<1x128xf32, #tpu.memory_space<vmem>>, %arg8: memref<16x128xf32, #tpu.memory_space<vmem>>) attributes {dimension_semantics = [#tpu.dimension_semantics<arbitrary>], iteration_bounds = array<i64: 1>, scalar_prefetch = 0 : i64, scratch_operands = 0 : i64, tpu.core_type = #tpu.core_type<tc>, window_params = [{transform_indices = @transform_0, window_bounds = array<i64: 16, 128>}, {pipeline_mode = #tpu.pipeline_mode<synchronous>, transform_indices = @transform_1, window_bounds = array<i64: 128, 128>}, {pipeline_mode = #tpu.pipeline_mode<synchronous>, transform_indices = @transform_2, window_bounds = array<i64: 1, 128>}, {pipeline_mode = #tpu.pipeline_mode<synchronous>, transform_indices = @transform_3, window_bounds = array<i64: 1, 128>}, {pipeline_mode = #tpu.pipeline_mode<synchronous>, transform_indices = @transform_4, window_bounds = array<i64: 1, 128>}, {pipeline_mode = #tpu.pipeline_mode<synchronous>, transform_indices = @transform_5, window_bounds = array<i64: 128, 128>}, {pipeline_mode = #tpu.pipeline_mode<synchronous>, transform_indices = @transform_6, window_bounds = array<i64: 1, 128>}, {transform_indices = @transform_7, window_bounds = array<i64: 16, 128>}]} {
    %c0 = arith.constant 0 : index
    %c0_0 = arith.constant 0 : index
    %0 = vector.load %arg1[%c0, %c0_0] : memref<16x128xbf16, #tpu.memory_space<vmem>>, vector<16x128xbf16>
    %c0_1 = arith.constant 0 : index
    %c0_2 = arith.constant 0 : index
    %1 = vector.load %arg2[%c0_1, %c0_2] : memref<128x128xbf16, #tpu.memory_space<vmem>>, vector<128x128xbf16>
    %cst = arith.constant dense<0.000000e+00> : vector<16x128xf32>
    %2 = tpu.matmul %0, %1, %cst {dimension_numbers = #tpu.dot_dimension_numbers<[1], [0], [0], [1], [0, 0, 1, 1], [], []>} : vector<16x128xbf16>, vector<128x128xbf16>, vector<16x128xf32> -> vector<16x128xf32>
    %c0_3 = arith.constant 0 : index
    %c0_4 = arith.constant 0 : index
    %3 = vector.load %arg3[%c0_3, %c0_4] : memref<1x128xf32, #tpu.memory_space<vmem>>, vector<1x128xf32>
    %4 = vector.broadcast %3 : vector<1x128xf32> to vector<16x128xf32>
    %5 = arith.addf %2, %4 : vector<16x128xf32>
    %6 = arith.mulf %5, %5 : vector<16x128xf32>
    %7 = arith.mulf %5, %6 : vector<16x128xf32>
    %cst_5 = arith.constant 4.471500e-02 : f32
    %8 = vector.broadcast %cst_5 : f32 to vector<16x128xf32>
    %9 = arith.mulf %8, %7 : vector<16x128xf32>
    %10 = arith.addf %5, %9 : vector<16x128xf32>
    %cst_6 = arith.constant 0.797884583 : f32
    %11 = vector.broadcast %cst_6 : f32 to vector<16x128xf32>
    %12 = arith.mulf %11, %10 : vector<16x128xf32>
    %13 = math.tanh %12 : vector<16x128xf32>
    %cst_7 = arith.constant 1.000000e+00 : f32
    %14 = vector.broadcast %cst_7 : f32 to vector<16x128xf32>
    %15 = arith.addf %14, %13 : vector<16x128xf32>
    %cst_8 = arith.constant 5.000000e-01 : f32
    %16 = vector.broadcast %cst_8 : f32 to vector<16x128xf32>
    %17 = arith.mulf %16, %15 : vector<16x128xf32>
    %18 = arith.mulf %5, %17 : vector<16x128xf32>
    %cst_9 = arith.constant dense<0.000000e+00> : vector<16xf32>
    %19 = vector.multi_reduction <add>, %18, %cst_9 [1] : vector<16x128xf32> to vector<16xf32>
    %20 = vector.shape_cast %19 : vector<16xf32> to vector<16x1xf32>
    %21 = arith.mulf %18, %18 : vector<16x128xf32>
    %cst_10 = arith.constant dense<0.000000e+00> : vector<16xf32>
    %22 = vector.multi_reduction <add>, %21, %cst_10 [1] : vector<16x128xf32> to vector<16xf32>
    %23 = vector.shape_cast %22 : vector<16xf32> to vector<16x1xf32>
    %cst_11 = arith.constant 1.562500e-02 : f32
    %24 = vector.broadcast %cst_11 : f32 to vector<16x1xf32>
    %25 = arith.mulf %20, %24 : vector<16x1xf32>
    %cst_12 = arith.constant 1.562500e-02 : f32
    %26 = vector.broadcast %cst_12 : f32 to vector<16x1xf32>
    %27 = arith.mulf %23, %26 : vector<16x1xf32>
    %28 = arith.mulf %25, %25 : vector<16x1xf32>
    %29 = arith.subf %27, %28 : vector<16x1xf32>
    %30 = vector.broadcast %25 : vector<16x1xf32> to vector<16x128xf32>
    %31 = arith.subf %18, %30 : vector<16x128xf32>
    %cst_13 = arith.constant 9.99999974E-6 : f32
    %32 = vector.broadcast %cst_13 : f32 to vector<16x1xf32>
    %33 = arith.addf %29, %32 : vector<16x1xf32>
    %34 = math.rsqrt %33 : vector<16x1xf32>
    %35 = vector.broadcast %34 : vector<16x1xf32> to vector<16x128xf32>
    %36 = arith.mulf %31, %35 : vector<16x128xf32>
    %c0_14 = arith.constant 0 : index
    %c0_15 = arith.constant 0 : index
    %37 = vector.load %arg4[%c0_14, %c0_15] : memref<1x128xf32, #tpu.memory_space<vmem>>, vector<1x128xf32>
    %38 = vector.broadcast %37 : vector<1x128xf32> to vector<16x128xf32>
    %39 = arith.mulf %36, %38 : vector<16x128xf32>
    %c0_16 = arith.constant 0 : index
    %c0_17 = arith.constant 0 : index
    %40 = vector.load %arg5[%c0_16, %c0_17] : memref<1x128xf32, #tpu.memory_space<vmem>>, vector<1x128xf32>
    %41 = vector.broadcast %40 : vector<1x128xf32> to vector<16x128xf32>
    %42 = arith.addf %39, %41 : vector<16x128xf32>
    %43 = arith.truncf %42 : vector<16x128xf32> to vector<16x128xbf16>
    %c0_18 = arith.constant 0 : index
    %c0_19 = arith.constant 0 : index
    %44 = vector.load %arg6[%c0_18, %c0_19] : memref<128x128xbf16, #tpu.memory_space<vmem>>, vector<128x128xbf16>
    %cst_20 = arith.constant dense<0.000000e+00> : vector<16x128xf32>
    %45 = tpu.matmul %43, %44, %cst_20 {dimension_numbers = #tpu.dot_dimension_numbers<[1], [0], [0], [1], [0, 0, 1, 1], [], []>} : vector<16x128xbf16>, vector<128x128xbf16>, vector<16x128xf32> -> vector<16x128xf32>
    %c0_21 = arith.constant 0 : index
    %c0_22 = arith.constant 0 : index
    %46 = vector.load %arg7[%c0_21, %c0_22] : memref<1x128xf32, #tpu.memory_space<vmem>>, vector<1x128xf32>
    %47 = vector.broadcast %46 : vector<1x128xf32> to vector<16x128xf32>
    %48 = arith.addf %45, %47 : vector<16x128xf32>
    %c0_23 = arith.constant 0 : index
    %c0_24 = arith.constant 0 : index
    %49 = vector.load %arg8[%c0_23, %c0_24] : memref<16x128xf32, #tpu.memory_space<vmem>>, vector<16x128xf32>
    tpu.vector_store %arg8[%c0_23, %c0_24], %48 {strides = array<i32>} : memref<16x128xf32, #tpu.memory_space<vmem>>, vector<16x128xf32>,
    return
  }
  func.func @transform_0(%arg0: i32) -> (i32, i32) {
    %c0_i32 = arith.constant 0 : i32
    %c0_i32_0 = arith.constant 0 : i32
    return %arg0, %c0_i32 : i32, i32
  }
  func.func @transform_1(%arg0: i32) -> (i32, i32) {
    %c0_i32 = arith.constant 0 : i32
    %c0_i32_0 = arith.constant 0 : i32
    %c0_i32_1 = arith.constant 0 : i32
    return %c0_i32, %c0_i32_0 : i32, i32
  }
  func.func @transform_2(%arg0: i32) -> (i32, i32) {
    %c0_i32 = arith.constant 0 : i32
    %c0_i32_0 = arith.constant 0 : i32
    %c0_i32_1 = arith.constant 0 : i32
    return %c0_i32, %c0_i32_0 : i32, i32
  }
  func.func @transform_3(%arg0: i32) -> (i32, i32) {
    %c0_i32 = arith.constant 0 : i32
    %c0_i32_0 = arith.constant 0 : i32
    %c0_i32_1 = arith.constant 0 : i32
    return %c0_i32, %c0_i32_0 : i32, i32
  }
  func.func @transform_4(%arg0: i32) -> (i32, i32) {
    %c0_i32 = arith.constant 0 : i32
    %c0_i32_0 = arith.constant 0 : i32
    %c0_i32_1 = arith.constant 0 : i32
    return %c0_i32, %c0_i32_0 : i32, i32
  }
  func.func @transform_5(%arg0: i32) -> (i32, i32) {
    %c0_i32 = arith.constant 0 : i32
    %c0_i32_0 = arith.constant 0 : i32
    %c0_i32_1 = arith.constant 0 : i32
    return %c0_i32, %c0_i32_0 : i32, i32
  }
  func.func @transform_6(%arg0: i32) -> (i32, i32) {
    %c0_i32 = arith.constant 0 : i32
    %c0_i32_0 = arith.constant 0 : i32
    %c0_i32_1 = arith.constant 0 : i32
    return %c0_i32, %c0_i32_0 : i32, i32
  }
  func.func @transform_7(%arg0: i32) -> (i32, i32) {
    %c0_i32 = arith.constant 0 : i32
    %c0_i32_0 = arith.constant 0 : i32
    return %arg0, %c0_i32 : i32, i32
  }
}

</mosaic_0001>

<bundles_post_ra>
// kernel: tpu_custom_call.1
= control target key start
LH: loop header
LB: loop body
LE: loop exit
PB: predicated region body
PF: predicated region fallthrough
CT: control target
= control target key end

     0   :  { %12 = vsyncpa [#allocation3], 0  ;;  %s622_s0 = inlined_call_operand.hbm [shape: bf16[16,128], index: 0, kind: input, shape index: {}]   ;;  %s623_s1 = inlined_call_operand.hbm [shape: bf16[128,128], index: 1, kind: input, shape index: {}]   ;;  %s624_s2 = inlined_call_operand.vmem [shape: f32[1,128], index: 2, kind: input, shape index: {}]   ;;  %s625_s3 = inlined_call_operand.vmem [shape: f32[1,128], index: 3, kind: input, shape index: {}]   ;;  %s626_s4 = inlined_call_operand.vmem [shape: f32[1,128], index: 4, kind: input, shape index: {}]   ;;  %s627_s5 = inlined_call_operand.hbm [shape: bf16[128,128], index: 5, kind: input, shape index: {}]   ;;  %s628_s6 = inlined_call_operand.vmem [shape: f32[1,128], index: 6, kind: input, shape index: {}]   ;;  %s629_s7 = inlined_call_operand.hbm [shape: f32[16,128], index: 7, kind: output, shape index: {}]  }
   0x1   :  { %13 = vsyncpa [#allocation6], 0 }
   0x2   :  { %14 = vsyncpa [#allocation4], 0  ;;  %s32_s26 = sshll.u32 %s623_s1, 4  ;;  %s550_s27 = smov [#allocation5]   ;;  %s33_s26 = int_to_ptr.hbm [resolvable:$true] %s32_s26 }
   0x3   :  { %s34_s28 = sshll.u32 %s550_s27, 4  ;;  %s19_s8 = sshll.u32 %s622_s0, 4  ;;  %s35_s28 = int_to_ptr.vmem [resolvable:$true] %s34_s28  ;;  %s20_s8 = int_to_ptr.hbm [resolvable:$true] %s19_s8 }
   0x4   :  { %s551_s9 = smov 64   ;;  %s552_s10 = smov 4  }
   0x5   :  { %40 = dma.hbm_to_vmem [thread:$0]  %s33_s26, 1024, %s35_s28, [#allocation6], %s551_s9, %s551_s9, %s552_s10  }
   0x6   :  { %s553_s11 = smov [#allocation2]   ;;  %s51_s15 = sshll.u32 %s627_s5, 4  ;;  %s52_s15 = int_to_ptr.hbm [resolvable:$true] %s51_s15 }
   0x7   :  { %s21_s12 = sshll.u32 %s553_s11, 4  ;;  %s554_s1 = smov [#allocation7]   ;;  %s22_s12 = int_to_ptr.vmem [resolvable:$true] %s21_s12 }
   0x8   :  { %27 = dma.hbm_to_vmem [thread:$0]  %s20_s8, 128, %s22_s12, [#allocation3], %s551_s9, %s551_s9, %s552_s10  }
   0x9   :  { %s53_s16 = sshll.u32 %s554_s1, 4  ;;  %s54_s16 = int_to_ptr.vmem [resolvable:$true] %s53_s16 }
   0xa   :  { %59 = dma.hbm_to_vmem [thread:$0]  %s52_s15, 1024, %s54_s16, [#allocation6], %s551_s9, %s551_s9, %s552_s10  }
   0xb   :  { %544 = dma.done.wait [#allocation3], 128  }
   0xc   :  { %545 = vsyncadd [#allocation3], 4294967168 }
   0xd   :  { %546 = dma.done.wait [#allocation6], 2048  }
   0xe   :  { %547 = vsyncadd [#allocation6], 4294965248  ;;  %v419_v0 = vld [vmem:[#allocation5 + $0x38] sm:$0xff]  ;;  %v418_v1 = vld [vmem:[#allocation5 + $0x30] sm:$0xff]  ;;  %s329_s25 = sshll.u32 %s629_s7, 4  ;;  %s557_s26 = smov 8   ;;  %s330_s25 = int_to_ptr.hbm [resolvable:$true] %s329_s25 }
   0xf   :  { %150 = vmatpush.bf16.msra.mxu0 %v419_v0  ;;  %v417_v2 = vld [vmem:[#allocation5 + $0x28] sm:$0xff]  ;;  %v416_v3 = vld [vmem:[#allocation5 + $0x20] sm:$0xff]  ;;  %v415_v4 = vld [vmem:[#allocation5 + $0x18] sm:$0xff] }
  0x10   :  { %v414_v5 = vld [vmem:[#allocation5 + $0x10] sm:$0xff]  ;;  %v413_v6 = vld [vmem:[#allocation5 + $0x8] sm:$0xff]  ;;  %v412_v7 = vld [vmem:[#allocation5] sm:$0xff] }
  0x11   :  { %v411_v8 = vld [vmem:[#allocation2] sm:$0xff]  ;;  %v426_v35 = vld [vmem:[#allocation7 + $0x30] sm:$0xff]  ;;  %v425_v36 = vld [vmem:[#allocation7 + $0x28] sm:$0xff] }
  0x12   :  { %v436_v9 = vld [vmem:[%s624_s2] ss:$0 sm:$0xff]  ;;  %v424_v37 = vld [vmem:[#allocation7 + $0x20] sm:$0xff]  ;;  %v422_v39 = vld [vmem:[#allocation7 + $0x10] sm:$0xff] }
  0x13   :  { %151 = vmatpush.bf16.msra.mxu0 %v418_v1  ;;  %v427_v34 = vld [vmem:[#allocation7 + $0x38] sm:$0xff]  ;;  %v421_v41 = vld [vmem:[#allocation7 + $0x8] sm:$0xff]  ;;  %v420_v46 = vld [vmem:[#allocation7] sm:$0xff] }
  0x14   :  { %307 = vmatpush.bf16.msra.mxu1 %v427_v34  ;;  %v423_v38 = vld [vmem:[#allocation7 + $0x18] sm:$0xff] }
  0x17   :  { %152 = vmatpush.bf16.msra.mxu0 %v417_v2 }
  0x18   :  { %308 = vmatpush.bf16.msra.mxu1 %v426_v35 }
  0x1b   :  { %153 = vmatpush.bf16.msra.mxu0 %v416_v3 }
  0x1c   :  { %309 = vmatpush.bf16.msra.mxu1 %v425_v36 }
  0x1f   :  { %154 = vmatpush.bf16.msra.mxu0 %v415_v4 }
  0x20   :  { %310 = vmatpush.bf16.msra.mxu1 %v424_v37 }
  0x23   :  { %155 = vmatpush.bf16.msra.mxu0 %v414_v5 }
  0x24   :  { %311 = vmatpush.bf16.msra.mxu1 %v423_v38 }
  0x27   :  { %156 = vmatpush.bf16.msra.mxu0 %v413_v6  ;;  %v437_v6 = vld [vmem:[%s625_s3] ss:$0 sm:$0xff]  ;;  %s555_s3 = smov [#allocation8]  }
  0x28   :  { %312 = vmatpush.bf16.msra.mxu1 %v422_v39  ;;  %s327_s22 = sshll.u32 %s555_s3, 4  ;;  %s328_s22 = int_to_ptr.vmem [resolvable:$true] %s327_s22 }
  0x2b   :  { %157 = vmatpush.bf16.msra.mxu0 %v412_v7 }
  0x2c   :  { %313 = vmatpush.bf16.msra.mxu1 %v421_v41 }
  0x2e   :  { %158 = vmatmul.bf16.vlgmr.msra.gmra.mxu0 %v411_v8 }
  0x30   :  { %314 = vmatpush.bf16.msra.mxu1 %v420_v46 }
  0xab   :  { %v159_v10 = vpop.f32.mrf.mxu0 }
  0xac   :  { %v160_v11 = vadd.f32 %v436_v9, %v159_v10 }
  0xae   :  { %v164_v12 = vmul.f32 %v160_v11, %v160_v11 }
  0xb0   :  { %v166_v13 = vmul.f32 %v164_v12, %v160_v11  ;;  %v438_v12 = vld [vmem:[%s626_s4] ss:$0 sm:$0xff]  ;;  %s556_s4 = smov 128  }
  0xb2   :  { %v168_v14 = vmul.f32 0.044715, %v166_v13 }
  0xb3   :  { %v161_v15 = vpop.f32.mrf.mxu0 }
  0xb4   :  { %v170_v16 = vadd.f32 %v168_v14, %v160_v11  ;;  %v162_v17 = vadd.f32 %v436_v9, %v161_v15 }
  0xb6   :  { %v165_v18 = vmul.f32 %v162_v17, %v162_v17  ;;  %v172_v19 = vmul.f32 0.7978846, %v170_v16 }
  0xb8   :  { %v167_v20 = vmul.f32 %v165_v18, %v162_v17  ;;  %440 = vtanh.f32 %v172_v19 }
  0xba   :  { %v169_v21 = vmul.f32 0.044715, %v167_v20 }
  0xbc   :  { %v171_v22 = vadd.f32 %v169_v21, %v162_v17 }
  0xbe   :  { %v441_v23 = vpop.eup %440  ;;  %v173_v24 = vmul.f32 0.7978846, %v171_v22 }
  0xbf   :  { %v176_v25 = vadd.f32 1.0, %v441_v23 }
  0xc0   :  { %442 = vtanh.f32 %v173_v24 }
  0xc1   :  { %v178_v26 = vmul.f32 0.5, %v176_v25 }
  0xc3   :  { %v180_v27 = vmul.f32 %v178_v26, %v160_v11 }
  0xc5   :  { %182 = vadd.xlane.f32.xlu0 %v180_v27  ;;  %v186_v28 = vmul.f32 %v180_v27, %v180_v27 }
  0xc6   :  { %v443_v29 = vpop.eup %442 }
  0xc7   :  { %188 = vadd.xlane.f32.xlu1 %v186_v28  ;;  %v177_v30 = vadd.f32 1.0, %v443_v29 }
  0xc9   :  { %v179_v31 = vmul.f32 0.5, %v177_v30 }
  0xcb   :  { %v181_v32 = vmul.f32 %v179_v31, %v162_v17  ;;  %v439_v17 = vld [vmem:[%s628_s6] ss:$0 sm:$0xff] }
  0xcd   :  { %184 = vadd.xlane.f32.xlu0 %v181_v32  ;;  %v187_v33 = vmul.f32 %v181_v32, %v181_v32 }
  0xcf   :  { %190 = vadd.xlane.f32.xlu1 %v187_v33 }
 0x138   :  { %v183_v40 = vpop.xlane.xlu0 %182 }
 0x139   :  { %v192_v42 = vmul.f32 0.015625, %v183_v40 }
 0x13a   :  { %v189_v43 = vpop.xlane.xlu1 %188 }
 0x13b   :  { %v196_v44 = vmul.f32 %v192_v42, %v192_v42  ;;  %v194_v45 = vmul.f32 0.015625, %v189_v43  ;;  %v200_v3 = vsub.f32 %v180_v27, %v192_v42 }
 0x13d   :  { %v198_v47 = vsub.f32 %v194_v45, %v196_v44 }
 0x13f   :  { %v202_v48 = vadd.f32 1e-05, %v198_v47 }
 0x140   :  { %v185_v49 = vpop.xlane.xlu0 %184 }
 0x141   :  { %444 = vrsqrt.f32 %v202_v48  ;;  %v193_v50 = vmul.f32 0.015625, %v185_v49  ;;  %vm210_vm1 = vweird.f32 %v202_v48 }
 0x142   :  { %v191_v51 = vpop.xlane.xlu1 %190 }
 0x143   :  { %v197_v52 = vmul.f32 %v193_v50, %v193_v50  ;;  %v195_v53 = vmul.f32 0.015625, %v191_v51  ;;  %v201_v8 = vsub.f32 %v181_v32, %v193_v50 }
 0x145   :  { %v199_v54 = vsub.f32 %v195_v53, %v197_v52 }
 0x147   :  { %v445_v55 = vpop.eup %444  ;;  %v203_v56 = vadd.f32 1e-05, %v199_v54 }
 0x148   :  { %v205_v57 = vmul.f32 %v445_v55, %v202_v48  ;;  %vm211_vm0 = vweird.f32 %v445_v55 }
 0x149   :  { %446 = vrsqrt.f32 %v203_v56  ;;  %vm212_vm2 = vmor %vm210_vm1, %vm211_vm0  ;;  %vm220_vm4 = vweird.f32 %v203_v56 }
 0x14a   :  { %v206_v58 = vmul.f32 %v445_v55, %v205_v57 }
 0x14c   :  { %v207_v59 = vmul.f32 0.5, %v206_v58 }
 0x14e   :  { %v208_v60 = vsub.f32 1.5, %v207_v59 }
 0x14f   :  { %v447_v61 = vpop.eup %446 }
 0x150   :  { %v209_v62 = vmul.f32 %v445_v55, %v208_v60  ;;  %v215_v63 = vmul.f32 %v447_v61, %v203_v56  ;;  %vm221_vm3 = vweird.f32 %v447_v61 }
 0x151   :  { %vm222_vm5 = vmor %vm220_vm4, %vm221_vm3 }
 0x152   :  { %v216_v0 = vmul.f32 %v447_v61, %v215_v63  ;;  %v213_v2 = vsel %vm212_vm2, %v445_v55, %v209_v62 }
 0x153   :  { %v224_v5 = vmul.f32 %v213_v2, %v200_v3 }
 0x154   :  { %v217_v1 = vmul.f32 0.5, %v216_v0 }
 0x155   :  { %v230_v11 = vmul.f32 %v437_v6, %v224_v5 }
 0x156   :  { %v218_v4 = vsub.f32 1.5, %v217_v1 }
 0x157   :  { %v236_v14 = vadd.f32 %v438_v12, %v230_v11 }
 0x158   :  { %v219_v7 = vmul.f32 %v447_v61, %v218_v4 }
 0x15a   :  { %v223_v9 = vsel %vm222_vm5, %v447_v61, %v219_v7 }
 0x15b   :  { %v225_v10 = vmul.f32 %v223_v9, %v201_v8 }
 0x15d   :  { %v231_v13 = vmul.f32 %v437_v6, %v225_v10 }
 0x15f   :  { %v237_v15 = vadd.f32 %v438_v12, %v231_v13 }
 0x161   :  { %v238_v16 = vpack.c.bf16 %v237_v15, %v236_v14 }
 0x163   :  { %315 = vmatmul.bf16.vlgmr.msra.gmra.mxu1 %v238_v16 }
 0x1e0   :  { %v316_v18 = vpop.f32.mrf.mxu1 }
 0x1e1   :  { %v317_v19 = vadd.f32 %v439_v17, %v316_v18 }
 0x1e3   :  { %321 = vst [vmem:[#allocation8] sm:$0xff] %v317_v19 }
 0x1e8   :  { %v318_v20 = vpop.f32.mrf.mxu1 }
 0x1e9   :  { %v319_v21 = vadd.f32 %v439_v17, %v318_v20 }
 0x1eb   :  { %322 = vst [vmem:[#allocation8 + $0x8] sm:$0xff] %v319_v21 }
 0x1ec   :  { %335 = dma.vmem_to_hbm [thread:$0]  %s328_s22, 256, %s330_s25, [#allocation4], %s556_s4, %s556_s4, %s557_s26  }
 0x1ed   :  { %548 = dma.done.wait [#allocation4], 256  }
 0x1ee   :  { %549 = vsyncadd [#allocation4], 4294967040 }
 0x1ef   :  { %340 = vsyncpa [#allocation3], 1 }
 0x1f0   :  { %341 = vsyncpa [#allocation6], 1 }
 0x1f1   :  { %342 = vsyncpa [#allocation4], 1 }

</bundles_post_ra>
